<compile_context>
chip_gen: v7x
topology: tpu7x:2x2x1
jax: 0.10.0
libtpu: 0.0.40
codegen_flags: <defaults>
</compile_context>

<pallas_src>
import functools
import math

import jax
import jax.numpy as jnp
from jax import lax
from jax.experimental import pallas as pl
from jax.experimental.pallas import tpu as pltpu


# ----------------------------------------------------------------------------
# Fused kernel: one batch tile per grid step, all heads inside.
# ----------------------------------------------------------------------------
def _fused_mha_kernel(q_ref, k_ref, v_ref,
                      wq_ref, wk_ref, wv_ref, wo_ref,
                      bq_ref, bk_ref, bv_ref, bo_ref,
                      o_ref, *, heads, approx_recip):
    """Refs:
      q/k/v_ref : (batch_tile, seq, d_model)   activations (compute dtype)
      wq/wk/wv  : (heads, d_model, d_k)        per-head weights, pre-transposed
                  (wq pre-scaled by 1/sqrt(d_k))
      wo        : (heads, d_k, d_model)        per-head output-projection rows
      bq/bk/bv  : (heads, 1, d_k)  f32         (bq pre-scaled by 1/sqrt(d_k))
      bo        : (1, d_model)     f32
      o_ref     : (batch_tile, seq, d_model)
    """
    bt, seq, d_model = q_ref.shape
    rows = bt * seq
    d_k = wq_ref.shape[-1]
    cdt = wq_ref.dtype                       # MXU operand dtype (bf16 or f32)

    # Fold the batch tile into the matmul M dimension (layout-preserving when
    # seq % 8 == 0).
    xq = q_ref[...].reshape(rows, d_model)
    xk = k_ref[...].reshape(rows, d_model)
    xv = v_ref[...].reshape(rows, d_model)

    acc = jnp.zeros((rows, d_model), jnp.float32)

    # Static unroll over heads.  Weights were sliced per head in the wrapper,
    # so there is no in-kernel lane slicing and no concat: each head reads
    # wq_ref[h] (leading-dim index) and accumulates its output-projection
    # contribution directly into `acc`.
    for h in range(heads):
        qh = jnp.dot(xq, wq_ref[h], preferred_element_type=jnp.float32) + bq_ref[h]
        kh = jnp.dot(xk, wk_ref[h], preferred_element_type=jnp.float32) + bk_ref[h]
        vh = jnp.dot(xv, wv_ref[h], preferred_element_type=jnp.float32) + bv_ref[h]

        # (rows, d_k) -> (batch_tile, seq, d_k): attention is per batch element.
        qb = qh.reshape(bt, seq, d_k).astype(cdt)
        kb = kh.reshape(bt, seq, d_k).astype(cdt)
        vb = vh.reshape(bt, seq, d_k).astype(cdt)

        # scores = q @ k^T  (1/sqrt(d_k) already folded into wq / bq);
        # batched matmul with a leading batch dim, no transposes.
        s = jnp.einsum("bqd,bkd->bqk", qb, kb,
                       preferred_element_type=jnp.float32)

        # Numerically stable softmax, all statistics in f32.
        m = jnp.max(s, axis=-1, keepdims=True)
        e = jnp.exp(s - m)
        denom = jnp.sum(e, axis=-1, keepdims=True)
        p = e * pl.reciprocal(denom, approx=approx_recip)
        # TODO(synk): mask path / training-mode dropout would go here.

        oh = jnp.einsum("bqk,bkd->bqd", p.astype(cdt), vb,
                        preferred_element_type=jnp.float32)      # (bt, seq, d_k)

        # This head's slice of the output projection (no concat needed).
        acc = acc + jnp.dot(oh.reshape(rows, d_k).astype(cdt), wo_ref[h],
                            preferred_element_type=jnp.float32)

    out = acc + bo_ref[...]
    # TODO(synk): lane-dense (unmasked) store only when d_model % 128 == 0.
    o_ref[...] = out.reshape(bt, seq, d_model).astype(o_ref.dtype)


# ----------------------------------------------------------------------------
# One-time parameter preparation (hoisted out of the forward path)
# ----------------------------------------------------------------------------
def prepare_params(params, heads, compute_dtype=jnp.bfloat16):
    """Slice per head, pre-transpose to (d_in, d_out), fold 1/sqrt(d_k) into
    wq/bq, cast MXU operands to `compute_dtype`, keep biases in f32."""
    d_model = params["wq"].shape[0]
    assert d_model % heads == 0, "d_model must be divisible by heads"
    d_k = d_model // heads
    scale = 1.0 / math.sqrt(d_k)

    def per_head_in(w):          # (out, in) -> (heads, d_model_in, d_k)
        return jnp.transpose(w.reshape(heads, d_k, d_model), (0, 2, 1))

    prep = dict(
        wq=(per_head_in(params["wq"]) * scale).astype(compute_dtype),
        wk=per_head_in(params["wk"]).astype(compute_dtype),
        wv=per_head_in(params["wv"]).astype(compute_dtype),
        wo=params["wo"].T.reshape(heads, d_k, d_model).astype(compute_dtype),
        bq=(params["bq"].reshape(heads, 1, d_k) * scale).astype(jnp.float32),
        bk=params["bk"].reshape(heads, 1, d_k).astype(jnp.float32),
        bv=params["bv"].reshape(heads, 1, d_k).astype(jnp.float32),
        bo=params["bo"].reshape(1, d_model).astype(jnp.float32),
    )
    meta = dict(heads=heads, d_k=d_k, d_model=d_model, compute_dtype=compute_dtype)
    return prep, meta


# ----------------------------------------------------------------------------
# Forward wrapper
# ----------------------------------------------------------------------------
def rtids_mha_forward(q, k, v, prep, meta, mask=None, *, approx_recip=True,
                      batch_tile=None, out_dtype=jnp.float32):
    """Fused forward of RTIDS_Multi_Head_Attention (eval mode, mask=None)."""
    assert mask is None, "TODO(synk): mask path not implemented"
    bs, seq, d_model = q.shape
    heads, d_k = meta["heads"], meta["d_k"]
    assert d_model == meta["d_model"]
    cdt = meta["compute_dtype"]

    # --- batch tiling: fold several batch elements into the matmul M dim ----
    if batch_tile is None:
        batch_tile = max(1, min(bs, 128 // max(seq, 1)))   # target ~128 rows
        while bs % batch_tile:
            batch_tile -= 1
    assert bs % batch_tile == 0, "batch_tile must divide batch size"
    grid = (bs // batch_tile,)

    qc = q.astype(cdt)
    kc = k.astype(cdt)
    vc = v.astype(cdt)

    io_spec = pl.BlockSpec((batch_tile, seq, d_model), lambda b: (b, 0, 0))
    # Weights / biases: whole-array, single-buffered VMEM residents (constant
    # index across the grid, so pipelined double-buffering would waste VMEM).
    const_spec = pl.BlockSpec(memory_space=pltpu.MemorySpace.VMEM)

    operands = (qc, kc, vc,
                prep["wq"], prep["wk"], prep["wv"], prep["wo"],
                prep["bq"], prep["bk"], prep["bv"], prep["bo"])

    # --- VMEM budget (v7x: 64 MiB physical, 32 MiB scoped default) ----------
    c_bytes = jnp.dtype(cdt).itemsize
    rows = batch_tile * seq
    weights_b = 4 * heads * d_model * d_k * c_bytes                 # resident once
    biases_b = (3 * heads * d_k + d_model) * 4
    io_b = 2 * (3 * rows * d_model * c_bytes
                + rows * d_model * jnp.dtype(out_dtype).itemsize)   # dbl-buffered
    work_b = (3 * rows * d_k + 2 * batch_tile * seq * seq + rows * d_model) * 4
    vmem_est = weights_b + biases_b + io_b + work_b
    vmem_limit = None
    if 2 * vmem_est > (32 << 20):
        vmem_limit = min(2 * vmem_est, 48 << 20)

    flops = (8 * bs * seq * d_model * d_model            # q/k/v/out projections
             + 4 * bs * heads * seq * seq * d_k)         # qk^T and p@v
    transcendentals = bs * heads * (seq * seq + seq)     # exp + reciprocal
    bytes_accessed = (sum(int(a.size) * a.dtype.itemsize for a in operands)
                      + bs * seq * d_model * jnp.dtype(out_dtype).itemsize)

    kernel = functools.partial(_fused_mha_kernel, heads=heads,
                               approx_recip=approx_recip)

    return pl.pallas_call(
        kernel,
        out_shape=jax.ShapeDtypeStruct((bs, seq, d_model), out_dtype),
        grid=grid,
        in_specs=[io_spec, io_spec, io_spec] + [const_spec] * 8,
        out_specs=io_spec,
        compiler_params=pltpu.CompilerParams(
            dimension_semantics=("parallel",),        # batch tiles independent
            vmem_limit_bytes=vmem_limit),
        cost_estimate=pl.CostEstimate(
            flops=flops, transcendentals=transcendentals,
            bytes_accessed=bytes_accessed),
    )(*operands)


# ----------------------------------------------------------------------------
# Pure-JAX reference (full f32 precision), matching the PyTorch module
# ----------------------------------------------------------------------------
def reference_forward(q, k, v, params, heads):
    bs, S, d_model = q.shape
    d_k = d_model // heads
    hi = lax.Precision.HIGHEST

    def lin(x, w, b):
        return jnp.dot(x, w.T, precision=hi) + b

    def split(x):
        return x.reshape(bs, S, heads, d_k).transpose(0, 2, 1, 3)

    qh = split(lin(q, params["wq"], params["bq"]))
    kh = split(lin(k, params["wk"], params["bk"]))
    vh = split(lin(v, params["wv"], params["bv"]))
    scores = jnp.einsum("bhqd,bhkd->bhqk", qh, kh, precision=hi) / math.sqrt(d_k)
    p = jax.nn.softmax(scores, axis=-1)
    attn = jnp.einsum("bhqk,bhkd->bhqd", p, vh, precision=hi)
    concat = attn.transpose(0, 2, 1, 3).reshape(bs, S, d_model)
    return lin(concat, params["wo"], params["bo"])


if __name__ == "__main__":
    heads = 4
    d_model = 32      # toy size; production should use d_model % 128 == 0
    seq = 8
    bs = 2
    dropout_p = 0.1   # unused (eval-mode semantics: dropout == identity)

    key = jax.random.PRNGKey(0)
    keys = jax.random.split(key, 11)

    def init_linear(kw, kb, fan_in, fan_out):
        bound = 1.0 / math.sqrt(fan_in)
        w = jax.random.uniform(kw, (fan_out, fan_in), jnp.float32, -bound, bound)
        b = jax.random.uniform(kb, (fan_out,), jnp.float32, -bound, bound)
        return w, b

    wq, bq = init_linear(keys[0], keys[1], d_model, d_model)
    wk, bk = init_linear(keys[2], keys[3], d_model, d_model)
    wv, bv = init_linear(keys[4], keys[5], d_model, d_model)
    wo, bo = init_linear(keys[6], keys[7], d_model, d_model)
    params = dict(wq=wq, bq=bq, wk=wk, bk=bk, wv=wv, bv=bv, wo=wo, bo=bo)

    q = jax.random.normal(keys[8], (bs, seq, d_model), jnp.float32)
    k = jax.random.normal(keys[9], (bs, seq, d_model), jnp.float32)
    v = jax.random.normal(keys[10], (bs, seq, d_model), jnp.float32)

    ref = reference_forward(q, k, v, params, heads)

    # Exact-math config: f32 MXU operands, exact reciprocal, batch_tile=1
    # (2-step grid: exercises the multi-step / megacore path).
    prep32, meta32 = prepare_params(params, heads, compute_dtype=jnp.float32)
    out = rtids_mha_forward(q, k, v, prep32, meta32,
                            approx_recip=False, batch_tile=1)
    out = jax.block_until_ready(out)
    assert out.shape == (bs, seq, d_model)
    assert jnp.allclose(out, ref, atol=1e-4, rtol=1e-4), "f32 mismatch vs reference"

    # Performance config: bf16 MXU operands + EUP approx reciprocal, whole
    # batch folded into one 16-row matmul tile (auto batch_tile).
    prep16, meta16 = prepare_params(params, heads, compute_dtype=jnp.bfloat16)
    out_fast = rtids_mha_forward(q, k, v, prep16, meta16, approx_recip=True)
    out_fast = jax.block_until_ready(out_fast)
    assert out_fast.shape == (bs, seq, d_model)
    assert jnp.allclose(out_fast, ref, atol=1e-1, rtol=1e-1), \
        "bf16 mismatch vs reference"

    print("KERNEL_OK")
</pallas_src>

<mosaic_0001>
module attributes {stable_mosaic.version = 11 : i64} {
  func.func @_fused_mha_kernel(%arg0: i32, %arg1: memref<1x8x32xf32, #tpu.memory_space<vmem>>, %arg2: memref<1x8x32xf32, #tpu.memory_space<vmem>>, %arg3: memref<1x8x32xf32, #tpu.memory_space<vmem>>, %arg4: memref<4x32x8xf32, #tpu.memory_space<vmem>>, %arg5: memref<4x32x8xf32, #tpu.memory_space<vmem>>, %arg6: memref<4x32x8xf32, #tpu.memory_space<vmem>>, %arg7: memref<4x8x32xf32, #tpu.memory_space<vmem>>, %arg8: memref<4x1x8xf32, #tpu.memory_space<vmem>>, %arg9: memref<4x1x8xf32, #tpu.memory_space<vmem>>, %arg10: memref<4x1x8xf32, #tpu.memory_space<vmem>>, %arg11: memref<1x32xf32, #tpu.memory_space<vmem>>, %arg12: memref<1x8x32xf32, #tpu.memory_space<vmem>>) attributes {dimension_semantics = [#tpu.dimension_semantics<parallel>], iteration_bounds = array<i64: 2>, scalar_prefetch = 0 : i64, scratch_operands = 0 : i64, tpu.core_type = #tpu.core_type<tc>, window_params = [{transform_indices = @transform_0, window_bounds = array<i64: 1, 8, 32>}, {transform_indices = @transform_1, window_bounds = array<i64: 1, 8, 32>}, {transform_indices = @transform_2, window_bounds = array<i64: 1, 8, 32>}, {pipeline_mode = #tpu.pipeline_mode<synchronous>, transform_indices = @transform_3, window_bounds = array<i64: 4, 32, 8>}, {pipeline_mode = #tpu.pipeline_mode<synchronous>, transform_indices = @transform_4, window_bounds = array<i64: 4, 32, 8>}, {pipeline_mode = #tpu.pipeline_mode<synchronous>, transform_indices = @transform_5, window_bounds = array<i64: 4, 32, 8>}, {pipeline_mode = #tpu.pipeline_mode<synchronous>, transform_indices = @transform_6, window_bounds = array<i64: 4, 8, 32>}, {pipeline_mode = #tpu.pipeline_mode<synchronous>, transform_indices = @transform_7, window_bounds = array<i64: 4, 1, 8>}, {pipeline_mode = #tpu.pipeline_mode<synchronous>, transform_indices = @transform_8, window_bounds = array<i64: 4, 1, 8>}, {pipeline_mode = #tpu.pipeline_mode<synchronous>, transform_indices = @transform_9, window_bounds = array<i64: 4, 1, 8>}, {pipeline_mode = #tpu.pipeline_mode<synchronous>, transform_indices = @transform_10, window_bounds = array<i64: 1, 32>}, {transform_indices = @transform_11, window_bounds = array<i64: 1, 8, 32>}]} {
    %c0 = arith.constant 0 : index
    %c0_0 = arith.constant 0 : index
    %c0_1 = arith.constant 0 : index
    %0 = vector.load %arg1[%c0, %c0_0, %c0_1] : memref<1x8x32xf32, #tpu.memory_space<vmem>>, vector<1x8x32xf32>
    %1 = vector.shape_cast %0 : vector<1x8x32xf32> to vector<8x32xf32>
    %c0_2 = arith.constant 0 : index
    %c0_3 = arith.constant 0 : index
    %c0_4 = arith.constant 0 : index
    %2 = vector.load %arg2[%c0_2, %c0_3, %c0_4] : memref<1x8x32xf32, #tpu.memory_space<vmem>>, vector<1x8x32xf32>
    %3 = vector.shape_cast %2 : vector<1x8x32xf32> to vector<8x32xf32>
    %c0_5 = arith.constant 0 : index
    %c0_6 = arith.constant 0 : index
    %c0_7 = arith.constant 0 : index
    %4 = vector.load %arg3[%c0_5, %c0_6, %c0_7] : memref<1x8x32xf32, #tpu.memory_space<vmem>>, vector<1x8x32xf32>
    %5 = vector.shape_cast %4 : vector<1x8x32xf32> to vector<8x32xf32>
    %cst = arith.constant 0.000000e+00 : f32
    %6 = vector.broadcast %cst : f32 to vector<8x32xf32>
    %c0_8 = arith.constant 0 : index
    %c0_9 = arith.constant 0 : index
    %c0_10 = arith.constant 0 : index
    %7 = vector.load %arg4[%c0_8, %c0_9, %c0_10] : memref<4x32x8xf32, #tpu.memory_space<vmem>>, vector<1x32x8xf32>
    %8 = vector.shape_cast %7 : vector<1x32x8xf32> to vector<32x8xf32>
    %cst_11 = arith.constant dense<0.000000e+00> : vector<8x8xf32>
    %9 = tpu.matmul %1, %8, %cst_11 {dimension_numbers = #tpu.dot_dimension_numbers<[1], [0], [0], [1], [0, 0, 1, 1], [], []>} : vector<8x32xf32>, vector<32x8xf32>, vector<8x8xf32> -> vector<8x8xf32>
    %c0_12 = arith.constant 0 : index
    %c0_13 = arith.constant 0 : index
    %c0_14 = arith.constant 0 : index
    %10 = vector.load %arg8[%c0_12, %c0_13, %c0_14] : memref<4x1x8xf32, #tpu.memory_space<vmem>>, vector<1x1x8xf32>
    %11 = vector.shape_cast %10 : vector<1x1x8xf32> to vector<1x8xf32>
    %12 = vector.broadcast %11 : vector<1x8xf32> to vector<8x8xf32>
    %13 = arith.addf %9, %12 : vector<8x8xf32>
    %c0_15 = arith.constant 0 : index
    %c0_16 = arith.constant 0 : index
    %c0_17 = arith.constant 0 : index
    %14 = vector.load %arg5[%c0_15, %c0_16, %c0_17] : memref<4x32x8xf32, #tpu.memory_space<vmem>>, vector<1x32x8xf32>
    %15 = vector.shape_cast %14 : vector<1x32x8xf32> to vector<32x8xf32>
    %cst_18 = arith.constant dense<0.000000e+00> : vector<8x8xf32>
    %16 = tpu.matmul %3, %15, %cst_18 {dimension_numbers = #tpu.dot_dimension_numbers<[1], [0], [0], [1], [0, 0, 1, 1], [], []>} : vector<8x32xf32>, vector<32x8xf32>, vector<8x8xf32> -> vector<8x8xf32>
    %c0_19 = arith.constant 0 : index
    %c0_20 = arith.constant 0 : index
    %c0_21 = arith.constant 0 : index
    %17 = vector.load %arg9[%c0_19, %c0_20, %c0_21] : memref<4x1x8xf32, #tpu.memory_space<vmem>>, vector<1x1x8xf32>
    %18 = vector.shape_cast %17 : vector<1x1x8xf32> to vector<1x8xf32>
    %19 = vector.broadcast %18 : vector<1x8xf32> to vector<8x8xf32>
    %20 = arith.addf %16, %19 : vector<8x8xf32>
    %c0_22 = arith.constant 0 : index
    %c0_23 = arith.constant 0 : index
    %c0_24 = arith.constant 0 : index
    %21 = vector.load %arg6[%c0_22, %c0_23, %c0_24] : memref<4x32x8xf32, #tpu.memory_space<vmem>>, vector<1x32x8xf32>
    %22 = vector.shape_cast %21 : vector<1x32x8xf32> to vector<32x8xf32>
    %cst_25 = arith.constant dense<0.000000e+00> : vector<8x8xf32>
    %23 = tpu.matmul %5, %22, %cst_25 {dimension_numbers = #tpu.dot_dimension_numbers<[1], [0], [0], [1], [0, 0, 1, 1], [], []>} : vector<8x32xf32>, vector<32x8xf32>, vector<8x8xf32> -> vector<8x8xf32>
    %c0_26 = arith.constant 0 : index
    %c0_27 = arith.constant 0 : index
    %c0_28 = arith.constant 0 : index
    %24 = vector.load %arg10[%c0_26, %c0_27, %c0_28] : memref<4x1x8xf32, #tpu.memory_space<vmem>>, vector<1x1x8xf32>
    %25 = vector.shape_cast %24 : vector<1x1x8xf32> to vector<1x8xf32>
    %26 = vector.broadcast %25 : vector<1x8xf32> to vector<8x8xf32>
    %27 = arith.addf %23, %26 : vector<8x8xf32>
    %28 = vector.shape_cast %13 : vector<8x8xf32> to vector<1x8x8xf32>
    %29 = vector.shape_cast %20 : vector<8x8xf32> to vector<1x8x8xf32>
    %30 = vector.shape_cast %27 : vector<8x8xf32> to vector<1x8x8xf32>
    "tpu.trace_start"() <{level = 10 : i32, message = "bqd,bkd->bqk"}> : () -> ()
    %cst_29 = arith.constant dense<0.000000e+00> : vector<1x8x8xf32>
    %31 = tpu.matmul %28, %29, %cst_29 {dimension_numbers = #tpu.dot_dimension_numbers<[2], [2], [1], [1], [0, 0, 0, 1, 1, 1], [0], [0]>} : vector<1x8x8xf32>, vector<1x8x8xf32>, vector<1x8x8xf32> -> vector<1x8x8xf32>
    "tpu.trace_stop"() : () -> ()
    %cst_30 = arith.constant dense<0xFF800000> : vector<1x8xf32>
    %32 = vector.multi_reduction <maximumf>, %31, %cst_30 [2] : vector<1x8x8xf32> to vector<1x8xf32>
    %33 = vector.shape_cast %32 : vector<1x8xf32> to vector<1x8x1xf32>
    %34 = vector.broadcast %33 : vector<1x8x1xf32> to vector<1x8x8xf32>
    %35 = arith.subf %31, %34 : vector<1x8x8xf32>
    %36 = math.exp %35 : vector<1x8x8xf32>
    %cst_31 = arith.constant dense<0.000000e+00> : vector<1x8xf32>
    %37 = vector.multi_reduction <add>, %36, %cst_31 [2] : vector<1x8x8xf32> to vector<1x8xf32>
    %38 = vector.shape_cast %37 : vector<1x8xf32> to vector<1x8x1xf32>
    %39 = tpu.reciprocal %38 : vector<1x8x1xf32> -> vector<1x8x1xf32>
    %40 = vector.broadcast %39 : vector<1x8x1xf32> to vector<1x8x8xf32>
    %41 = arith.mulf %36, %40 : vector<1x8x8xf32>
    "tpu.trace_start"() <{level = 10 : i32, message = "bqk,bkd->bqd"}> : () -> ()
    %cst_32 = arith.constant dense<0.000000e+00> : vector<1x8x8xf32>
    %42 = tpu.matmul %41, %30, %cst_32 {dimension_numbers = #tpu.dot_dimension_numbers<[2], [1], [1], [2], [0, 0, 0, 1, 1, 2], [0], [0]>} : vector<1x8x8xf32>, vector<1x8x8xf32>, vector<1x8x8xf32> -> vector<1x8x8xf32>
    "tpu.trace_stop"() : () -> ()
    %43 = vector.shape_cast %42 : vector<1x8x8xf32> to vector<8x8xf32>
    %c0_33 = arith.constant 0 : index
    %c0_34 = arith.constant 0 : index
    %c0_35 = arith.constant 0 : index
    %44 = vector.load %arg7[%c0_33, %c0_34, %c0_35] : memref<4x8x32xf32, #tpu.memory_space<vmem>>, vector<1x8x32xf32>
    %45 = vector.shape_cast %44 : vector<1x8x32xf32> to vector<8x32xf32>
    %cst_36 = arith.constant dense<0.000000e+00> : vector<8x32xf32>
    %46 = tpu.matmul %43, %45, %cst_36 {dimension_numbers = #tpu.dot_dimension_numbers<[1], [0], [0], [1], [0, 0, 1, 1], [], []>} : vector<8x8xf32>, vector<8x32xf32>, vector<8x32xf32> -> vector<8x32xf32>
    %47 = arith.addf %6, %46 : vector<8x32xf32>
    %c1 = arith.constant 1 : index
    %c0_37 = arith.constant 0 : index
    %c0_38 = arith.constant 0 : index
    %48 = vector.load %arg4[%c1, %c0_37, %c0_38] : memref<4x32x8xf32, #tpu.memory_space<vmem>>, vector<1x32x8xf32>
    %49 = vector.shape_cast %48 : vector<1x32x8xf32> to vector<32x8xf32>
    %cst_39 = arith.constant dense<0.000000e+00> : vector<8x8xf32>
    %50 = tpu.matmul %1, %49, %cst_39 {dimension_numbers = #tpu.dot_dimension_numbers<[1], [0], [0], [1], [0, 0, 1, 1], [], []>} : vector<8x32xf32>, vector<32x8xf32>, vector<8x8xf32> -> vector<8x8xf32>
    %c1_40 = arith.constant 1 : index
    %c0_41 = arith.constant 0 : index
    %c0_42 = arith.constant 0 : index
    %51 = vector.load %arg8[%c1_40, %c0_41, %c0_42] : memref<4x1x8xf32, #tpu.memory_space<vmem>>, vector<1x1x8xf32>
    %52 = vector.shape_cast %51 : vector<1x1x8xf32> to vector<1x8xf32>
    %53 = vector.broadcast %52 : vector<1x8xf32> to vector<8x8xf32>
    %54 = arith.addf %50, %53 : vector<8x8xf32>
    %c1_43 = arith.constant 1 : index
    %c0_44 = arith.constant 0 : index
    %c0_45 = arith.constant 0 : index
    %55 = vector.load %arg5[%c1_43, %c0_44, %c0_45] : memref<4x32x8xf32, #tpu.memory_space<vmem>>, vector<1x32x8xf32>
    %56 = vector.shape_cast %55 : vector<1x32x8xf32> to vector<32x8xf32>
    %cst_46 = arith.constant dense<0.000000e+00> : vector<8x8xf32>
    %57 = tpu.matmul %3, %56, %cst_46 {dimension_numbers = #tpu.dot_dimension_numbers<[1], [0], [0], [1], [0, 0, 1, 1], [], []>} : vector<8x32xf32>, vector<32x8xf32>, vector<8x8xf32> -> vector<8x8xf32>
    %c1_47 = arith.constant 1 : index
    %c0_48 = arith.constant 0 : index
    %c0_49 = arith.constant 0 : index
    %58 = vector.load %arg9[%c1_47, %c0_48, %c0_49] : memref<4x1x8xf32, #tpu.memory_space<vmem>>, vector<1x1x8xf32>
    %59 = vector.shape_cast %58 : vector<1x1x8xf32> to vector<1x8xf32>
    %60 = vector.broadcast %59 : vector<1x8xf32> to vector<8x8xf32>
    %61 = arith.addf %57, %60 : vector<8x8xf32>
    %c1_50 = arith.constant 1 : index
    %c0_51 = arith.constant 0 : index
    %c0_52 = arith.constant 0 : index
    %62 = vector.load %arg6[%c1_50, %c0_51, %c0_52] : memref<4x32x8xf32, #tpu.memory_space<vmem>>, vector<1x32x8xf32>
    %63 = vector.shape_cast %62 : vector<1x32x8xf32> to vector<32x8xf32>
    %cst_53 = arith.constant dense<0.000000e+00> : vector<8x8xf32>
    %64 = tpu.matmul %5, %63, %cst_53 {dimension_numbers = #tpu.dot_dimension_numbers<[1], [0], [0], [1], [0, 0, 1, 1], [], []>} : vector<8x32xf32>, vector<32x8xf32>, vector<8x8xf32> -> vector<8x8xf32>
    %c1_54 = arith.constant 1 : index
    %c0_55 = arith.constant 0 : index
    %c0_56 = arith.constant 0 : index
    %65 = vector.load %arg10[%c1_54, %c0_55, %c0_56] : memref<4x1x8xf32, #tpu.memory_space<vmem>>, vector<1x1x8xf32>
    %66 = vector.shape_cast %65 : vector<1x1x8xf32> to vector<1x8xf32>
    %67 = vector.broadcast %66 : vector<1x8xf32> to vector<8x8xf32>
    %68 = arith.addf %64, %67 : vector<8x8xf32>
    %69 = vector.shape_cast %54 : vector<8x8xf32> to vector<1x8x8xf32>
    %70 = vector.shape_cast %61 : vector<8x8xf32> to vector<1x8x8xf32>
    %71 = vector.shape_cast %68 : vector<8x8xf32> to vector<1x8x8xf32>
    "tpu.trace_start"() <{level = 10 : i32, message = "bqd,bkd->bqk"}> : () -> ()
    %cst_57 = arith.constant dense<0.000000e+00> : vector<1x8x8xf32>
    %72 = tpu.matmul %69, %70, %cst_57 {dimension_numbers = #tpu.dot_dimension_numbers<[2], [2], [1], [1], [0, 0, 0, 1, 1, 1], [0], [0]>} : vector<1x8x8xf32>, vector<1x8x8xf32>, vector<1x8x8xf32> -> vector<1x8x8xf32>
    "tpu.trace_stop"() : () -> ()
    %cst_58 = arith.constant dense<0xFF800000> : vector<1x8xf32>
    %73 = vector.multi_reduction <maximumf>, %72, %cst_58 [2] : vector<1x8x8xf32> to vector<1x8xf32>
    %74 = vector.shape_cast %73 : vector<1x8xf32> to vector<1x8x1xf32>
    %75 = vector.broadcast %74 : vector<1x8x1xf32> to vector<1x8x8xf32>
    %76 = arith.subf %72, %75 : vector<1x8x8xf32>
    %77 = math.exp %76 : vector<1x8x8xf32>
    %cst_59 = arith.constant dense<0.000000e+00> : vector<1x8xf32>
    %78 = vector.multi_reduction <add>, %77, %cst_59 [2] : vector<1x8x8xf32> to vector<1x8xf32>
    %79 = vector.shape_cast %78 : vector<1x8xf32> to vector<1x8x1xf32>
    %80 = tpu.reciprocal %79 : vector<1x8x1xf32> -> vector<1x8x1xf32>
    %81 = vector.broadcast %80 : vector<1x8x1xf32> to vector<1x8x8xf32>
    %82 = arith.mulf %77, %81 : vector<1x8x8xf32>
    "tpu.trace_start"() <{level = 10 : i32, message = "bqk,bkd->bqd"}> : () -> ()
    %cst_60 = arith.constant dense<0.000000e+00> : vector<1x8x8xf32>
    %83 = tpu.matmul %82, %71, %cst_60 {dimension_numbers = #tpu.dot_dimension_numbers<[2], [1], [1], [2], [0, 0, 0, 1, 1, 2], [0], [0]>} : vector<1x8x8xf32>, vector<1x8x8xf32>, vector<1x8x8xf32> -> vector<1x8x8xf32>
    "tpu.trace_stop"() : () -> ()
    %84 = vector.shape_cast %83 : vector<1x8x8xf32> to vector<8x8xf32>
    %c1_61 = arith.constant 1 : index
    %c0_62 = arith.constant 0 : index
    %c0_63 = arith.constant 0 : index
    %85 = vector.load %arg7[%c1_61, %c0_62, %c0_63] : memref<4x8x32xf32, #tpu.memory_space<vmem>>, vector<1x8x32xf32>
    %86 = vector.shape_cast %85 : vector<1x8x32xf32> to vector<8x32xf32>
    %cst_64 = arith.constant dense<0.000000e+00> : vector<8x32xf32>
    %87 = tpu.matmul %84, %86, %cst_64 {dimension_numbers = #tpu.dot_dimension_numbers<[1], [0], [0], [1], [0, 0, 1, 1], [], []>} : vector<8x8xf32>, vector<8x32xf32>, vector<8x32xf32> -> vector<8x32xf32>
    %88 = arith.addf %47, %87 : vector<8x32xf32>
    %c2 = arith.constant 2 : index
    %c0_65 = arith.constant 0 : index
    %c0_66 = arith.constant 0 : index
    %89 = vector.load %arg4[%c2, %c0_65, %c0_66] : memref<4x32x8xf32, #tpu.memory_space<vmem>>, vector<1x32x8xf32>
    %90 = vector.shape_cast %89 : vector<1x32x8xf32> to vector<32x8xf32>
    %cst_67 = arith.constant dense<0.000000e+00> : vector<8x8xf32>
    %91 = tpu.matmul %1, %90, %cst_67 {dimension_numbers = #tpu.dot_dimension_numbers<[1], [0], [0], [1], [0, 0, 1, 1], [], []>} : vector<8x32xf32>, vector<32x8xf32>, vector<8x8xf32> -> vector<8x8xf32>
    %c2_68 = arith.constant 2 : index
    %c0_69 = arith.constant 0 : index
    %c0_70 = arith.constant 0 : index
    %92 = vector.load %arg8[%c2_68, %c0_69, %c0_70] : memref<4x1x8xf32, #tpu.memory_space<vmem>>, vector<1x1x8xf32>
    %93 = vector.shape_cast %92 : vector<1x1x8xf32> to vector<1x8xf32>
    %94 = vector.broadcast %93 : vector<1x8xf32> to vector<8x8xf32>
    %95 = arith.addf %91, %94 : vector<8x8xf32>
    %c2_71 = arith.constant 2 : index
    %c0_72 = arith.constant 0 : index
    %c0_73 = arith.constant 0 : index
    %96 = vector.load %arg5[%c2_71, %c0_72, %c0_73] : memref<4x32x8xf32, #tpu.memory_space<vmem>>, vector<1x32x8xf32>
    %97 = vector.shape_cast %96 : vector<1x32x8xf32> to vector<32x8xf32>
    %cst_74 = arith.constant dense<0.000000e+00> : vector<8x8xf32>
    %98 = tpu.matmul %3, %97, %cst_74 {dimension_numbers = #tpu.dot_dimension_numbers<[1], [0], [0], [1], [0, 0, 1, 1], [], []>} : vector<8x32xf32>, vector<32x8xf32>, vector<8x8xf32> -> vector<8x8xf32>
    %c2_75 = arith.constant 2 : index
    %c0_76 = arith.constant 0 : index
    %c0_77 = arith.constant 0 : index
    %99 = vector.load %arg9[%c2_75, %c0_76, %c0_77] : memref<4x1x8xf32, #tpu.memory_space<vmem>>, vector<1x1x8xf32>
    %100 = vector.shape_cast %99 : vector<1x1x8xf32> to vector<1x8xf32>
    %101 = vector.broadcast %100 : vector<1x8xf32> to vector<8x8xf32>
    %102 = arith.addf %98, %101 : vector<8x8xf32>
    %c2_78 = arith.constant 2 : index
    %c0_79 = arith.constant 0 : index
    %c0_80 = arith.constant 0 : index
    %103 = vector.load %arg6[%c2_78, %c0_79, %c0_80] : memref<4x32x8xf32, #tpu.memory_space<vmem>>, vector<1x32x8xf32>
    %104 = vector.shape_cast %103 : vector<1x32x8xf32> to vector<32x8xf32>
    %cst_81 = arith.constant dense<0.000000e+00> : vector<8x8xf32>
    %105 = tpu.matmul %5, %104, %cst_81 {dimension_numbers = #tpu.dot_dimension_numbers<[1], [0], [0], [1], [0, 0, 1, 1], [], []>} : vector<8x32xf32>, vector<32x8xf32>, vector<8x8xf32> -> vector<8x8xf32>
    %c2_82 = arith.constant 2 : index
    %c0_83 = arith.constant 0 : index
    %c0_84 = arith.constant 0 : index
    %106 = vector.load %arg10[%c2_82, %c0_83, %c0_84] : memref<4x1x8xf32, #tpu.memory_space<vmem>>, vector<1x1x8xf32>
    %107 = vector.shape_cast %106 : vector<1x1x8xf32> to vector<1x8xf32>
    %108 = vector.broadcast %107 : vector<1x8xf32> to vector<8x8xf32>
    %109 = arith.addf %105, %108 : vector<8x8xf32>
    %110 = vector.shape_cast %95 : vector<8x8xf32> to vector<1x8x8xf32>
    %111 = vector.shape_cast %102 : vector<8x8xf32> to vector<1x8x8xf32>
    %112 = vector.shape_cast %109 : vector<8x8xf32> to vector<1x8x8xf32>
    "tpu.trace_start"() <{level = 10 : i32, message = "bqd,bkd->bqk"}> : () -> ()
    %cst_85 = arith.constant dense<0.000000e+00> : vector<1x8x8xf32>
    %113 = tpu.matmul %110, %111, %cst_85 {dimension_numbers = #tpu.dot_dimension_numbers<[2], [2], [1], [1], [0, 0, 0, 1, 1, 1], [0], [0]>} : vector<1x8x8xf32>, vector<1x8x8xf32>, vector<1x8x8xf32> -> vector<1x8x8xf32>
    "tpu.trace_stop"() : () -> ()
    %cst_86 = arith.constant dense<0xFF800000> : vector<1x8xf32>
    %114 = vector.multi_reduction <maximumf>, %113, %cst_86 [2] : vector<1x8x8xf32> to vector<1x8xf32>
    %115 = vector.shape_cast %114 : vector<1x8xf32> to vector<1x8x1xf32>
    %116 = vector.broadcast %115 : vector<1x8x1xf32> to vector<1x8x8xf32>
    %117 = arith.subf %113, %116 : vector<1x8x8xf32>
    %118 = math.exp %117 : vector<1x8x8xf32>
    %cst_87 = arith.constant dense<0.000000e+00> : vector<1x8xf32>
    %119 = vector.multi_reduction <add>, %118, %cst_87 [2] : vector<1x8x8xf32> to vector<1x8xf32>
    %120 = vector.shape_cast %119 : vector<1x8xf32> to vector<1x8x1xf32>
    %121 = tpu.reciprocal %120 : vector<1x8x1xf32> -> vector<1x8x1xf32>
    %122 = vector.broadcast %121 : vector<1x8x1xf32> to vector<1x8x8xf32>
    %123 = arith.mulf %118, %122 : vector<1x8x8xf32>
    "tpu.trace_start"() <{level = 10 : i32, message = "bqk,bkd->bqd"}> : () -> ()
    %cst_88 = arith.constant dense<0.000000e+00> : vector<1x8x8xf32>
    %124 = tpu.matmul %123, %112, %cst_88 {dimension_numbers = #tpu.dot_dimension_numbers<[2], [1], [1], [2], [0, 0, 0, 1, 1, 2], [0], [0]>} : vector<1x8x8xf32>, vector<1x8x8xf32>, vector<1x8x8xf32> -> vector<1x8x8xf32>
    "tpu.trace_stop"() : () -> ()
    %125 = vector.shape_cast %124 : vector<1x8x8xf32> to vector<8x8xf32>
    %c2_89 = arith.constant 2 : index
    %c0_90 = arith.constant 0 : index
    %c0_91 = arith.constant 0 : index
    %126 = vector.load %arg7[%c2_89, %c0_90, %c0_91] : memref<4x8x32xf32, #tpu.memory_space<vmem>>, vector<1x8x32xf32>
    %127 = vector.shape_cast %126 : vector<1x8x32xf32> to vector<8x32xf32>
    %cst_92 = arith.constant dense<0.000000e+00> : vector<8x32xf32>
    %128 = tpu.matmul %125, %127, %cst_92 {dimension_numbers = #tpu.dot_dimension_numbers<[1], [0], [0], [1], [0, 0, 1, 1], [], []>} : vector<8x8xf32>, vector<8x32xf32>, vector<8x32xf32> -> vector<8x32xf32>
    %129 = arith.addf %88, %128 : vector<8x32xf32>
    %c3 = arith.constant 3 : index
    %c0_93 = arith.constant 0 : index
    %c0_94 = arith.constant 0 : index
    %130 = vector.load %arg4[%c3, %c0_93, %c0_94] : memref<4x32x8xf32, #tpu.memory_space<vmem>>, vector<1x32x8xf32>
    %131 = vector.shape_cast %130 : vector<1x32x8xf32> to vector<32x8xf32>
    %cst_95 = arith.constant dense<0.000000e+00> : vector<8x8xf32>
    %132 = tpu.matmul %1, %131, %cst_95 {dimension_numbers = #tpu.dot_dimension_numbers<[1], [0], [0], [1], [0, 0, 1, 1], [], []>} : vector<8x32xf32>, vector<32x8xf32>, vector<8x8xf32> -> vector<8x8xf32>
    %c3_96 = arith.constant 3 : index
    %c0_97 = arith.constant 0 : index
    %c0_98 = arith.constant 0 : index
    %133 = vector.load %arg8[%c3_96, %c0_97, %c0_98] : memref<4x1x8xf32, #tpu.memory_space<vmem>>, vector<1x1x8xf32>
    %134 = vector.shape_cast %133 : vector<1x1x8xf32> to vector<1x8xf32>
    %135 = vector.broadcast %134 : vector<1x8xf32> to vector<8x8xf32>
    %136 = arith.addf %132, %135 : vector<8x8xf32>
    %c3_99 = arith.constant 3 : index
    %c0_100 = arith.constant 0 : index
    %c0_101 = arith.constant 0 : index
    %137 = vector.load %arg5[%c3_99, %c0_100, %c0_101] : memref<4x32x8xf32, #tpu.memory_space<vmem>>, vector<1x32x8xf32>
    %138 = vector.shape_cast %137 : vector<1x32x8xf32> to vector<32x8xf32>
    %cst_102 = arith.constant dense<0.000000e+00> : vector<8x8xf32>
    %139 = tpu.matmul %3, %138, %cst_102 {dimension_numbers = #tpu.dot_dimension_numbers<[1], [0], [0], [1], [0, 0, 1, 1], [], []>} : vector<8x32xf32>, vector<32x8xf32>, vector<8x8xf32> -> vector<8x8xf32>
    %c3_103 = arith.constant 3 : index
    %c0_104 = arith.constant 0 : index
    %c0_105 = arith.constant 0 : index
    %140 = vector.load %arg9[%c3_103, %c0_104, %c0_105] : memref<4x1x8xf32, #tpu.memory_space<vmem>>, vector<1x1x8xf32>
    %141 = vector.shape_cast %140 : vector<1x1x8xf32> to vector<1x8xf32>
    %142 = vector.broadcast %141 : vector<1x8xf32> to vector<8x8xf32>
    %143 = arith.addf %139, %142 : vector<8x8xf32>
    %c3_106 = arith.constant 3 : index
    %c0_107 = arith.constant 0 : index
    %c0_108 = arith.constant 0 : index
    %144 = vector.load %arg6[%c3_106, %c0_107, %c0_108] : memref<4x32x8xf32, #tpu.memory_space<vmem>>, vector<1x32x8xf32>
    %145 = vector.shape_cast %144 : vector<1x32x8xf32> to vector<32x8xf32>
    %cst_109 = arith.constant dense<0.000000e+00> : vector<8x8xf32>
    %146 = tpu.matmul %5, %145, %cst_109 {dimension_numbers = #tpu.dot_dimension_numbers<[1], [0], [0], [1], [0, 0, 1, 1], [], []>} : vector<8x32xf32>, vector<32x8xf32>, vector<8x8xf32> -> vector<8x8xf32>
    %c3_110 = arith.constant 3 : index
    %c0_111 = arith.constant 0 : index
    %c0_112 = arith.constant 0 : index
    %147 = vector.load %arg10[%c3_110, %c0_111, %c0_112] : memref<4x1x8xf32, #tpu.memory_space<vmem>>, vector<1x1x8xf32>
    %148 = vector.shape_cast %147 : vector<1x1x8xf32> to vector<1x8xf32>
    %149 = vector.broadcast %148 : vector<1x8xf32> to vector<8x8xf32>
    %150 = arith.addf %146, %149 : vector<8x8xf32>
    %151 = vector.shape_cast %136 : vector<8x8xf32> to vector<1x8x8xf32>
    %152 = vector.shape_cast %143 : vector<8x8xf32> to vector<1x8x8xf32>
    %153 = vector.shape_cast %150 : vector<8x8xf32> to vector<1x8x8xf32>
    "tpu.trace_start"() <{level = 10 : i32, message = "bqd,bkd->bqk"}> : () -> ()
    %cst_113 = arith.constant dense<0.000000e+00> : vector<1x8x8xf32>
    %154 = tpu.matmul %151, %152, %cst_113 {dimension_numbers = #tpu.dot_dimension_numbers<[2], [2], [1], [1], [0, 0, 0, 1, 1, 1], [0], [0]>} : vector<1x8x8xf32>, vector<1x8x8xf32>, vector<1x8x8xf32> -> vector<1x8x8xf32>
    "tpu.trace_stop"() : () -> ()
    %cst_114 = arith.constant dense<0xFF800000> : vector<1x8xf32>
    %155 = vector.multi_reduction <maximumf>, %154, %cst_114 [2] : vector<1x8x8xf32> to vector<1x8xf32>
    %156 = vector.shape_cast %155 : vector<1x8xf32> to vector<1x8x1xf32>
    %157 = vector.broadcast %156 : vector<1x8x1xf32> to vector<1x8x8xf32>
    %158 = arith.subf %154, %157 : vector<1x8x8xf32>
    %159 = math.exp %158 : vector<1x8x8xf32>
    %cst_115 = arith.constant dense<0.000000e+00> : vector<1x8xf32>
    %160 = vector.multi_reduction <add>, %159, %cst_115 [2] : vector<1x8x8xf32> to vector<1x8xf32>
    %161 = vector.shape_cast %160 : vector<1x8xf32> to vector<1x8x1xf32>
    %162 = tpu.reciprocal %161 : vector<1x8x1xf32> -> vector<1x8x1xf32>
    %163 = vector.broadcast %162 : vector<1x8x1xf32> to vector<1x8x8xf32>
    %164 = arith.mulf %159, %163 : vector<1x8x8xf32>
    "tpu.trace_start"() <{level = 10 : i32, message = "bqk,bkd->bqd"}> : () -> ()
    %cst_116 = arith.constant dense<0.000000e+00> : vector<1x8x8xf32>
    %165 = tpu.matmul %164, %153, %cst_116 {dimension_numbers = #tpu.dot_dimension_numbers<[2], [1], [1], [2], [0, 0, 0, 1, 1, 2], [0], [0]>} : vector<1x8x8xf32>, vector<1x8x8xf32>, vector<1x8x8xf32> -> vector<1x8x8xf32>
    "tpu.trace_stop"() : () -> ()
    %166 = vector.shape_cast %165 : vector<1x8x8xf32> to vector<8x8xf32>
    %c3_117 = arith.constant 3 : index
    %c0_118 = arith.constant 0 : index
    %c0_119 = arith.constant 0 : index
    %167 = vector.load %arg7[%c3_117, %c0_118, %c0_119] : memref<4x8x32xf32, #tpu.memory_space<vmem>>, vector<1x8x32xf32>
    %168 = vector.shape_cast %167 : vector<1x8x32xf32> to vector<8x32xf32>
    %cst_120 = arith.constant dense<0.000000e+00> : vector<8x32xf32>
    %169 = tpu.matmul %166, %168, %cst_120 {dimension_numbers = #tpu.dot_dimension_numbers<[1], [0], [0], [1], [0, 0, 1, 1], [], []>} : vector<8x8xf32>, vector<8x32xf32>, vector<8x32xf32> -> vector<8x32xf32>
    %170 = arith.addf %129, %169 : vector<8x32xf32>
    %c0_121 = arith.constant 0 : index
    %c0_122 = arith.constant 0 : index
    %171 = vector.load %arg11[%c0_121, %c0_122] : memref<1x32xf32, #tpu.memory_space<vmem>>, vector<1x32xf32>
    %172 = vector.broadcast %171 : vector<1x32xf32> to vector<8x32xf32>
    %173 = arith.addf %170, %172 : vector<8x32xf32>
    %174 = vector.shape_cast %173 : vector<8x32xf32> to vector<1x8x32xf32>
    %c0_123 = arith.constant 0 : index
    %c0_124 = arith.constant 0 : index
    %c0_125 = arith.constant 0 : index
    %175 = vector.load %arg12[%c0_123, %c0_124, %c0_125] : memref<1x8x32xf32, #tpu.memory_space<vmem>>, vector<1x8x32xf32>
    tpu.vector_store %arg12[%c0_123, %c0_124, %c0_125], %174 {strides = array<i32>} : memref<1x8x32xf32, #tpu.memory_space<vmem>>, vector<1x8x32xf32>,
    return
  }
  func.func @transform_0(%arg0: i32) -> (i32, i32, i32) {
    %c0_i32 = arith.constant 0 : i32
    %c0_i32_0 = arith.constant 0 : i32
    %c0_i32_1 = arith.constant 0 : i32
    return %arg0, %c0_i32, %c0_i32_0 : i32, i32, i32
  }
  func.func @transform_1(%arg0: i32) -> (i32, i32, i32) {
    %c0_i32 = arith.constant 0 : i32
    %c0_i32_0 = arith.constant 0 : i32
    %c0_i32_1 = arith.constant 0 : i32
    return %arg0, %c0_i32, %c0_i32_0 : i32, i32, i32
  }
  func.func @transform_2(%arg0: i32) -> (i32, i32, i32) {
    %c0_i32 = arith.constant 0 : i32
    %c0_i32_0 = arith.constant 0 : i32
    %c0_i32_1 = arith.constant 0 : i32
    return %arg0, %c0_i32, %c0_i32_0 : i32, i32, i32
  }
  func.func @transform_3(%arg0: i32) -> (i32, i32, i32) {
    %c0_i32 = arith.constant 0 : i32
    %c0_i32_0 = arith.constant 0 : i32
    %c0_i32_1 = arith.constant 0 : i32
    %c0_i32_2 = arith.constant 0 : i32
    return %c0_i32, %c0_i32_0, %c0_i32_1 : i32, i32, i32
  }
  func.func @transform_4(%arg0: i32) -> (i32, i32, i32) {
    %c0_i32 = arith.constant 0 : i32
    %c0_i32_0 = arith.constant 0 : i32
    %c0_i32_1 = arith.constant 0 : i32
    %c0_i32_2 = arith.constant 0 : i32
    return %c0_i32, %c0_i32_0, %c0_i32_1 : i32, i32, i32
  }
  func.func @transform_5(%arg0: i32) -> (i32, i32, i32) {
    %c0_i32 = arith.constant 0 : i32
    %c0_i32_0 = arith.constant 0 : i32
    %c0_i32_1 = arith.constant 0 : i32
    %c0_i32_2 = arith.constant 0 : i32
    return %c0_i32, %c0_i32_0, %c0_i32_1 : i32, i32, i32
  }
  func.func @transform_6(%arg0: i32) -> (i32, i32, i32) {
    %c0_i32 = arith.constant 0 : i32
    %c0_i32_0 = arith.constant 0 : i32
    %c0_i32_1 = arith.constant 0 : i32
    %c0_i32_2 = arith.constant 0 : i32
    return %c0_i32, %c0_i32_0, %c0_i32_1 : i32, i32, i32
  }
  func.func @transform_7(%arg0: i32) -> (i32, i32, i32) {
    %c0_i32 = arith.constant 0 : i32
    %c0_i32_0 = arith.constant 0 : i32
    %c0_i32_1 = arith.constant 0 : i32
    %c0_i32_2 = arith.constant 0 : i32
    return %c0_i32, %c0_i32_0, %c0_i32_1 : i32, i32, i32
  }
  func.func @transform_8(%arg0: i32) -> (i32, i32, i32) {
    %c0_i32 = arith.constant 0 : i32
    %c0_i32_0 = arith.constant 0 : i32
    %c0_i32_1 = arith.constant 0 : i32
    %c0_i32_2 = arith.constant 0 : i32
    return %c0_i32, %c0_i32_0, %c0_i32_1 : i32, i32, i32
  }
  func.func @transform_9(%arg0: i32) -> (i32, i32, i32) {
    %c0_i32 = arith.constant 0 : i32
    %c0_i32_0 = arith.constant 0 : i32
    %c0_i32_1 = arith.constant 0 : i32
    %c0_i32_2 = arith.constant 0 : i32
    return %c0_i32, %c0_i32_0, %c0_i32_1 : i32, i32, i32
  }
  func.func @transform_10(%arg0: i32) -> (i32, i32) {
    %c0_i32 = arith.constant 0 : i32
    %c0_i32_0 = arith.constant 0 : i32
    %c0_i32_1 = arith.constant 0 : i32
    return %c0_i32, %c0_i32_0 : i32, i32
  }
  func.func @transform_11(%arg0: i32) -> (i32, i32, i32) {
    %c0_i32 = arith.constant 0 : i32
    %c0_i32_0 = arith.constant 0 : i32
    %c0_i32_1 = arith.constant 0 : i32
    return %arg0, %c0_i32, %c0_i32_0 : i32, i32, i32
  }
}

</mosaic_0001>

<bundles_post_ra>
// kernel: tpu_custom_call.1
= control target key start
LH: loop header
LB: loop body
LE: loop exit
PB: predicated region body
PF: predicated region fallthrough
CT: control target
= control target key end

     0   :  { %s3550_s0 = inlined_call_operand.vmem [shape: f32[2,8,32], index: 0, kind: input, shape index: {}]   ;;  %s3551_s1 = inlined_call_operand.vmem [shape: f32[2,8,32], index: 1, kind: input, shape index: {}]   ;;  %s3552_s2 = inlined_call_operand.vmem [shape: f32[2,8,32], index: 2, kind: input, shape index: {}]   ;;  %s3553_s3 = inlined_call_operand.vmem [shape: f32[4,32,8], index: 3, kind: input, shape index: {}]   ;;  %s3554_s4 = inlined_call_operand.vmem [shape: f32[4,32,8], index: 4, kind: input, shape index: {}]   ;;  %s3555_s5 = inlined_call_operand.vmem [shape: f32[4,32,8], index: 5, kind: input, shape index: {}]   ;;  %s3556_s6 = inlined_call_operand.vmem [shape: f32[4,8,32], index: 6, kind: input, shape index: {}]   ;;  %s3557_s7 = inlined_call_operand.vmem [shape: f32[4,1,8], index: 7, kind: input, shape index: {}]   ;;  %s3558_s8 = inlined_call_operand.vmem [shape: f32[4,1,8], index: 8, kind: input, shape index: {}]   ;;  %s3559_s9 = inlined_call_operand.vmem [shape: f32[4,1,8], index: 9, kind: input, shape index: {}]   ;;  %s3560_s10 = inlined_call_operand.vmem [shape: f32[1,32], index: 10, kind: input, shape index: {}]   ;;  %s3561_s11 = inlined_call_operand.hbm [shape: f32[2,8,32], index: 11, kind: output, shape index: {}]  }
   0x1   :  { %3562 = sst [smem:[#allocation5_spill]] %s3550_s0 }
   0x2   :  { %16 = vsyncpa [#allocation3], 0 }
   0x3   :  { %18 = vsyncpa [#allocation3 + $0x1], 0  ;;  %s3102_s17 = smov 0   ;;  %s3104_s18 = smov 0  }
   0x4   :  { %s3106_s19 = smov 0   ;;  %s3108_s20 = smov 0  }
   0x5 LB: > { %s3123_s21 = sadd.s32 4294967295, %s3036_s20   ;;  %s2467_s22 = sadd.s32 4294967294, %s3036_s20   ;;  %s3036_s20 = sphi %s3108_s20, %s3569_s20   ;;  %s3032_s19 = sphi %s3106_s19, %s3568_s19   ;;  %s3028_s18 = sphi %s3104_s18, %s3567_s18   ;;  %s3024_s17 = sphi %s3102_s17, %s3566_s17  }
   0x6   : > { %s3127_s23 = sadd.s32 1, %s3036_s20   ;;  %s277_s24 = sadd.s32 1, %s3032_s19 }
   0x7   : > { %s274_s25 = ssub.s32 %s3036_s20, %s3127_s23  ;;  %p287_p0 = scmp.ne.s32.totalorder %s3032_s19, %s3028_s18 }
   0x8   : > { %p275_p1 = scmp.eq.s32.totalorder %s274_s25, 0  ;;  %p288_p2 = scmp.eq.s32.totalorder %s3123_s21, 1 }
   0x9   : > { %p293_p3 = scmp.ne.s32.totalorder %s3028_s18, %s3024_s17  ;;  %p294_p4 = scmp.eq.s32.totalorder %s2467_s22, 1 }
   0xa   : > { %s3138_s26 = scalar_select %p275_p1, %s3032_s19, %s277_s24  }
   0xb   : > { %p3140_p5 = por %p288_p2, %p287_p0  ;;  %p3144_p6 = por %p294_p4, %p293_p3 }
   0xc   : > { %p2470_p7 = scmp.ge.s32.totalorder %s3036_s20, 1  ;;  %p357_p8 = scmp.lt.s32.totalorder %s3036_s20, 3 }
   0xe   : > { %p358_p9 = pnand %p2470_p7, %p357_p8 }
   0xf   : > { %v504_v0 = vld [vmem:[%s3554_s4] sm:$0xff] (!%p358_p9)  ;;  %v505_v1 = vld [vmem:[%s3554_s4 + $0x8] sm:$0xff] (!%p358_p9)  ;;  %v3038_v3 = vmov (!%p358_p9), 0.0|0.0   ;;  %v506_v6 = vld [vmem:[%s3554_s4 + $0x10] sm:$0xff] (!%p358_p9)  ;;  %p404_p10 = scmp.lt.s32.totalorder (!%p358_p9), %s3123_s21, 1  ;;  %vm3039_vm0 = vmmov (!%p358_p9), 0  }
  0x10   : > { %361 = sbr.rel (%p358_p9) target bundleno = 3887 (0xf2f), region = 64  ;;  %v419_v2 = vld [vmem:[%s3553_s3] sm:$0xff] (!%p358_p9)  ;;  %2850 = vmatprep.subr.bf16.mxu1 (!%p358_p9), %v3038_v3  ;;  %v2851_v4 = vpack.c.bf16 (!%p358_p9), %v505_v1, %v504_v0  ;;  %2844 = vmatprep.subr.bf16.mxu0 (!%p358_p9), %v3038_v3  ;;  %v420_v5 = vld [vmem:[%s3553_s3 + $0x8] sm:$0xff] (!%p358_p9)  ;;  %v507_v7 = vld [vmem:[%s3554_s4 + $0x18] sm:$0xff] (!%p358_p9)  ;;  %v3040_v11 = vmov (!%p358_p9), 0.0   ;;  %s3565_s0 = sld [smem:[#allocation5_spill]] (!%p358_p9) }
  0x11   : > { %v2845_v8 = vpack.c.bf16 (!%p358_p9), %v420_v5, %v419_v2  ;;  %v421_v9 = vld [vmem:[%s3553_s3 + $0x10] sm:$0xff] (!%p358_p9)  ;;  %v422_v10 = vld [vmem:[%s3553_s3 + $0x18] sm:$0xff] (!%p358_p9)  ;;  %2671 = vmatprep.mubr.msk.f32.mxu1 (!%p358_p9), %vm3039_vm0, %v3040_v11  ;;  %2660 = vmatprep.mubr.msk.f32.mxu0 (!%p358_p9), %vm3039_vm0, %v3040_v11  ;;  %v2854_v12 = vpack.c.bf16 (!%p358_p9), %v507_v7, %v506_v6  ;;  %vm430_vm1 = vcmask (!%p358_p9), 261120   ;;  %v2477_v16 = vld [vmem:[%s3558_s8] ss:$0 sm:$0xff] (!%p358_p9)  ;;  %vm672_vm2 = vcmask (!%p358_p9), 64512  }
  0x12   : > { %2852 = vmatpush3.bf16.msra.mxu1 (!%p358_p9), %v2851_v4  ;;  %v2848_v13 = vpack.c.bf16 (!%p358_p9), %v422_v10, %v421_v9  ;;  %v2475_v17 = vld [vmem:[%s3557_s7] ss:$0 sm:$0xff] (!%p358_p9)  ;;  %v589_v25 = vld [vmem:[%s3555_s5 + $0x8] sm:$0xff] (!%p358_p9)  ;;  %v590_v26 = vld [vmem:[%s3555_s5 + $0x10] sm:$0xff] (!%p358_p9)  ;;  %s2565_s14 = sshll.u32 (!%p358_p9), %s3123_s21, 7 }
  0x13   : > { %2846 = vmatpush3.bf16.msra.mxu0 (!%p358_p9), %v2845_v8  ;;  %2853 = vmatprep.subr.bf16.mxu1 (!%p358_p9), %v3038_v3  ;;  %v588_v24 = vld [vmem:[%s3555_s5] sm:$0xff] (!%p358_p9)  ;;  %v591_v28 = vld [vmem:[%s3555_s5 + $0x18] sm:$0xff] (!%p358_p9)  ;;  %v2485_v44 = vld [vmem:[%s3553_s3 + $0x28] sm:$0xff] (!%p358_p9) }
  0x14   : > { %2847 = vmatprep.subr.bf16.mxu0 (!%p358_p9), %v3038_v3  ;;  %v2857_v27 = vpack.c.bf16 (!%p358_p9), %v589_v25, %v588_v24  ;;  %v2860_v29 = vpack.c.bf16 (!%p358_p9), %v591_v28, %v590_v26  ;;  %v2479_v40 = vld [vmem:[%s3559_s9] ss:$0 sm:$0xff] (!%p358_p9)  ;;  %v2486_v46 = vld [vmem:[%s3553_s3 + $0x30] sm:$0xff] (!%p358_p9)  ;;  %v2487_v47 = vld [vmem:[%s3553_s3 + $0x38] sm:$0xff] (!%p358_p9) }
  0x15   : > { %v2484_v43 = vld [vmem:[%s3553_s3 + $0x20] sm:$0xff] (!%p358_p9)  ;;  %v2866_v48 = vpack.c.bf16 (!%p358_p9), %v2487_v47, %v2486_v46  ;;  %v2492_v51 = vld [vmem:[%s3554_s4 + $0x28] sm:$0xff] (!%p358_p9)  ;;  %v2493_v55 = vld [vmem:[%s3554_s4 + $0x30] sm:$0xff] (!%p358_p9) }
  0x16   : > { %2855 = vmatpush3.bf16.msra.mxu1 (!%p358_p9), %v2854_v12  ;;  %v2863_v45 = vpack.c.bf16 (!%p358_p9), %v2485_v44, %v2484_v43  ;;  %v2491_v50 = vld [vmem:[%s3554_s4 + $0x20] sm:$0xff] (!%p358_p9)  ;;  %v2494_v56 = vld [vmem:[%s3554_s4 + $0x38] sm:$0xff] (!%p358_p9)  ;;  %v2499_v6 = vld [vmem:[%s3555_s5 + $0x28] sm:$0xff] (!%p358_p9) }
  0x17   : > { %s405_s16 = scalar_select %p404_p10, %s3123_s21, 1  ;;  %2849 = vmatpush3.bf16.msra.mxu0 %v2848_v13  ;;  %2685 = vmatprep.subr.mxu1 %v3040_v11  ;;  %v2869_v53 = vpack.c.bf16 %v2492_v51, %v2491_v50  ;;  %v2872_v57 = vpack.c.bf16 %v2494_v56, %v2493_v55  ;;  %v2496_v62 = vld [vmem:[%s3558_s8 + $0x1] ss:$0 sm:$0xff]  ;;  %v2500_v7 = vld [vmem:[%s3555_s5 + $0x30] sm:$0xff]  ;;  %v2501_v9 = vld [vmem:[%s3555_s5 + $0x38] sm:$0xff] }
  0x18   : > { %2856 = vmatprep.subr.bf16.mxu0 %v3038_v3  ;;  %v2489_v63 = vld [vmem:[%s3557_s7 + $0x1] ss:$0 sm:$0xff]  ;;  %v2878_v10 = vpack.c.bf16 %v2501_v9, %v2500_v7  ;;  %v2508_v26 = vld [vmem:[%s3556_s6 + $0x8] sm:$0xff]  ;;  %v2516_v55 = vld [vmem:[%s3557_s7 + $0x2] ss:$0 sm:$0xff]  ;;  %s3041_s21 = smov [#allocation2]  }
  0x19   : > { %s3184_s22 = sshll.u32 %s405_s16, 3  ;;  %v2498_v5 = vld [vmem:[%s3555_s5 + $0x20] sm:$0xff] }
  0x1a   : > { %s411_s29 = scalar_lea.vmem %s3551_s1, %s3184_s22  ;;  %s407_s13 = scalar_lea.vmem %s3565_s0, %s3184_s22  ;;  %v2875_v8 = vpack.c.bf16 %v2499_v6, %v2498_v5 }
  0x1b   : > { %v3194_v14 = vld [vmem:[%s411_s29] sm:$0xff]  ;;  %s415_s29 = scalar_lea.vmem %s3552_s2, %s3184_s22  ;;  %s401_s22 = sand.u32 1, %s3028_s18  }
  0x1c   : > { %v3196_v15 = vld [vmem:[%s407_s13] sm:$0xff]  ;;  %2672 = vmatmul.mubr.msk.f32.vlgmr.msra.gmra.mrb[0].mxu1 %vm430_vm1, %v3194_v14  ;;  %s2471_s30 = sshll.u32 %s401_s22, 3  ;;  %s2371_s12 = scalar_lea.sflag [#allocation3], %s401_s22 }
  0x1d   : > { %2661 = vmatmul.mubr.msk.f32.vlgmr.msra.gmra.mrb[0].mxu0 %vm430_vm1, %v3196_v15  ;;  %2687 = vmatprep.mubr.msk.f32.mxu1 %vm3039_vm0, %v3040_v11  ;;  %v3236_v30 = vld [vmem:[%s415_s29] sm:$0xff]  ;;  %s403_s15 = scalar_lea.vmem [#allocation2], %s2471_s30  ;;  %s3507_s29 = scalar_lea.hbm %s3561_s11, %s2565_s14 }
  0x1e   : > { %2682 = vmatprep.mubr.msk.f32.mxu0 %vm3039_vm0, %v3040_v11  ;;  %2858 = vmatpush3.bf16.msra.mxu0 %v2857_v27  ;;  %s2384_s16 = sshll.u32 %s403_s15, 4  ;;  %s2978_s30 = sshll.u32 %s3041_s21, 4  ;;  %s3509_s16 = int_to_ptr.vmem [resolvable:$true] %s2384_s16  ;;  %s2979_s30 = int_to_ptr.vmem [resolvable:$false] %s2978_s30 }
  0x1f   : > { %2859 = vmatprep.subr.bf16.mxu0 %v3038_v3  ;;  %s2974_s13 = scalar_lea.vmem %s3509_s16, 128  ;;  %s2980_s0 = scalar_lea.vmem %s2979_s30, 256 }
  0x20   : > { %p2975_p11 = scmp.ne.s32.totalorder %s3509_s16, %s2974_s13  ;;  %p2981_p0 = scmp.lt.s32.totalorder %s3509_s16, %s2979_s30 }
  0x21   : > { %p2982_p1 = scmp.lt.s32.totalorder %s2980_s0, %s2974_s13 }
  0x22   : > { %2861 = vmatpush3.bf16.msra.mxu0 %v2860_v29  ;;  %p2976_p12 = pnand %p2975_p11, %p3140_p5 }
  0x23   : > { %2862 = vmatprep.subr.bf16.mxu0 %v3038_v3  ;;  %p2983_p2 = por %p2982_p1, %p2981_p0 }
  0x24   : > { %p2977_p13 = pneg %p2976_p12 }
  0x25   : > { %2683 = vmatmul.mubr.msk.f32.vlgmr.msra.gmra.mrb[2].mxu0 %vm430_vm1, %v3236_v30 }
  0x26   : > { %2703 = vmatprep.mubr.msk.f32.mxu0 %vm3039_vm0, %v3040_v11  ;;  %2864 = vmatpush3.bf16.msra.mxu0 %v2863_v45  ;;  %p2984_p3 = pnand %p2983_p2, %p2977_p13 }
  0x27   : > { %2865 = vmatprep.subr.bf16.mxu0 %v3038_v3 }
  0x2a   : > { %2867 = vmatpush3.bf16.msra.mxu0 %v2866_v48  ;;  %v2523_v48 = vld [vmem:[%s3558_s8 + $0x2] ss:$0 sm:$0xff] }
  0x2b   : > { %2874 = vmatprep.subr.bf16.mxu0 %v3038_v3 }
  0x2d   : > { %2704 = vmatmul.mubr.msk.f32.vlgmr.msra.gmra.mrb[4].mxu0 %vm430_vm1, %v3196_v15 }
  0x2e   : > { %2725 = vmatprep.mubr.msk.f32.mxu0 %vm3039_vm0, %v3040_v11  ;;  %2876 = vmatpush3.bf16.msra.mxu0 %v2875_v8 }
  0x2f   : > { %2877 = vmatprep.subr.bf16.mxu0 %v3038_v3 }
  0x32   : > { %2879 = vmatpush3.bf16.msra.mxu0 %v2878_v10 }
  0x33   : > { %2738 = vmatprep.subr.mxu0 %v3040_v11 }
  0x35   : > { %2726 = vmatmul.mubr.msk.f32.vlgmr.msra.gmra.mrb[6].mxu0 %vm430_vm1, %v3236_v30 }
  0x36   : > { %2740 = vmatprep.mubr.msk.f32.mxu0 %vm3039_vm0, %v3040_v11  ;;  %2739 = vmatpush3.msra.mxu0 %v2508_v26 }
  0x37   : > { %2880 = vmatprep.subr.bf16.mxu0 %v3038_v3 }
  0xef   : > { %v584_v18 = vpop.f32.mrb[0].mxu1 }
  0xf0   : > { %v585_v19 = vadd.f32 %v2477_v16, %v584_v18  ;;  %v2673_v20 = vpop.f32.mrb[1].mxu1  ;;  %v500_v21 = vpop.f32.mrb[0].mxu0 }
  0xf1   : > { %v501_v22 = vadd.f32 %v2475_v17, %v500_v21  ;;  %v2662_v23 = vpop.f32.mrb[1].mxu0 }
  0xf2   : > { %2686 = vmatpush3.xpose.msk.msra.mxu1 %vm672_vm2, %v585_v19  ;;  %v2503_v23 = vld [vmem:[%s3559_s9 + $0x1] ss:$0 sm:$0xff] }
  0xf3   : > { %2690 = vmatprep.subr.mxu1 %v3040_v11 }
  0xf5   : > { %2688 = vmatmul.mubr.msk.f32.vlgmr.msra.gmra.mrb[2].mxu1 %vm672_vm2, %v501_v22 }
  0xf6   : > { %2692 = vmatprep.mubr.msk.f32.mxu1 %vm3039_vm0, %v3040_v11 }
  0xf8   : > { %v668_v39 = vpop.f32.mrb[2].mxu0 }
  0xf9   : > { %v2684_v41 = vpop.f32.mrb[3].mxu0  ;;  %v669_v42 = vadd.f32 %v2479_v40, %v668_v39  ;;  %v2512_v39 = vld [vmem:[%s3553_s3 + $0x48] sm:$0xff] }
  0xfa   : > { %v2513_v41 = vld [vmem:[%s3553_s3 + $0x50] sm:$0xff] }
  0xfb   : > { %2691 = vmatpush3.msra.mxu1 %v669_v42  ;;  %v2514_v42 = vld [vmem:[%s3553_s3 + $0x58] sm:$0xff] }
  0xfc   : > { %2868 = vmatprep.subr.bf16.mxu1 %v3038_v3  ;;  %v2884_v45 = vpack.c.bf16 %v2514_v42, %v2513_v41  ;;  %v2542_v41 = vld [vmem:[%s3557_s7 + $0x3] ss:$0 sm:$0xff] }
 0x100   : > { %v913_v58 = vpop.f32.mrb[4].mxu0 }
 0x101   : > { %v2705_v59 = vpop.f32.mrb[5].mxu0  ;;  %v914_v4 = vadd.f32 %v2489_v63, %v913_v58  ;;  %v2528_v63 = vld [vmem:[%s3555_s5 + $0x58] sm:$0xff] }
 0x102   : > { %v2525_v59 = vld [vmem:[%s3555_s5 + $0x40] sm:$0xff] }
 0x108   : > { %v1079_v22 = vpop.f32.mrb[6].mxu0 }
 0x109   : > { %v2727_v24 = vpop.f32.mrb[7].mxu0  ;;  %v1080_v25 = vadd.f32 %v2503_v23, %v1079_v22  ;;  %v2538_v22 = vld [vmem:[%s3553_s3 + $0x68] sm:$0xff] }
 0x10a   : > { %v2539_v24 = vld [vmem:[%s3553_s3 + $0x70] sm:$0xff] }
 0x1c8   : > { %v745_v31 = vpop.f32.mrb[2].mxu1 }
 0x1c9   : > { %v2689_v32 = vpop.f32.mrb[3].mxu1  ;;  %v749_v33 = vsel %vm672_vm2, %v745_v31, -inf }
 0x1ca   : > { %750 = vmax.xlane.f32.xlu0 %v749_v33  ;;  %v2518_v32 = vld [vmem:[%s3554_s4 + $0x40] sm:$0xff]  ;;  %v2519_v33 = vld [vmem:[%s3554_s4 + $0x48] sm:$0xff] }
 0x257   : > { %v751_v34 = vpop.xlane.xlu0 %750 }
 0x258   : > { %v752_v35 = vsub.f32 %v745_v31, %v751_v34  ;;  %v833_v31 = vld [vmem:[%s3556_s6] sm:$0xff]  ;;  %v2887_v34 = vpack.c.bf16 %v2519_v33, %v2518_v32 }
 0x25a   : > { %v753_v36 = vmul.f32 1.442695, %v752_v35  ;;  %v2520_v35 = vld [vmem:[%s3554_s4 + $0x50] sm:$0xff] }
 0x25c   : > { %2958 = vpow2.f32 %v753_v36  ;;  %v2521_v36 = vld [vmem:[%s3554_s4 + $0x58] sm:$0xff] }
 0x266   : > { %v2959_v37 = vpop.eup %2958 }
 0x267   : > { %v755_v38 = vsel %vm672_vm2, %v2959_v37, 0.0 }
 0x268   : > { %756 = vadd.xlane.f32.xlu0 %v755_v38  ;;  %v2511_v38 = vld [vmem:[%s3553_s3 + $0x40] sm:$0xff] }
 0x269   : > { %v2881_v40 = vpack.c.bf16 %v2512_v39, %v2511_v38 }
 0x2f5   : > { %v757_v49 = vpop.xlane.xlu0 %756 }
 0x2f6   : > { %2960 = vrcp.f32 %v757_v49 }
 0x300   : > { %v2961_v52 = vpop.eup %2960 }
 0x301   : > { %v759_v54 = vmul.f32 %v2961_v52, %v2959_v37  ;;  %v2890_v37 = vpack.c.bf16 %v2521_v36, %v2520_v35 }
 0x303   : > { %2693 = vmatmul.mubr.msk.f32.vlgmr.msra.gmra.mrb[4].mxu1 %vm672_vm2, %v759_v54 }
 0x304   : > { %2870 = vmatpush3.bf16.msra.mxu1 %v2869_v53  ;;  %2714 = vmatprep.mubr.msk.f32.mxu1 %vm3039_vm0, %v3040_v11 }
 0x305   : > { %2871 = vmatprep.subr.bf16.mxu1 %v3038_v3 }
 0x308   : > { %2873 = vmatpush3.bf16.msra.mxu1 %v2872_v57 }
 0x309   : > { %2728 = vmatprep.subr.mxu1 %v3040_v11 }
 0x30b   : > { %2715 = vmatmul.mubr.msk.f32.vlgmr.msra.gmra.mrb[6].mxu1 %vm430_vm1, %v3194_v14 }
 0x30c   : > { %2730 = vmatprep.mubr.msk.f32.mxu1 %vm3039_vm0, %v3040_v11 }
 0x3d6   : > { %v829_v60 = vpop.f32.mrb[4].mxu1 }
 0x3d7   : > { %v2694_v61 = vpop.f32.mrb[5].mxu1 }
 0x3d8   : > { %v2527_v61 = vld [vmem:[%s3555_s5 + $0x50] sm:$0xff] }
 0x3de   : > { %v996_v0 = vpop.f32.mrb[6].mxu1 }
 0x3df   : > { %v997_v1 = vadd.f32 %v2496_v62, %v996_v0  ;;  %v2716_v2 = vpop.f32.mrb[7].mxu1  ;;  %v2896_v0 = vpack.c.bf16 %v2528_v63, %v2527_v61 }
 0x3e1   : > { %2729 = vmatpush3.xpose.msk.msra.mxu1 %vm672_vm2, %v997_v1 }
 0x3e2   : > { %2733 = vmatprep.subr.mxu1 %v3040_v11 }
 0x3e4   : > { %2731 = vmatmul.mubr.msk.f32.vlgmr.msra.gmra.mrb[8].mxu1 %vm672_vm2, %v914_v4 }
 0x3e5   : > { %2735 = vmatprep.mubr.msk.f32.mxu1 %vm3039_vm0, %v3040_v11  ;;  %2734 = vmatpush3.msra.mxu1 %v1080_v25  ;;  %v2540_v25 = vld [vmem:[%s3553_s3 + $0x78] sm:$0xff] }
 0x3e6   : > { %2743 = vmatprep.subr.mxu1 %v3040_v11  ;;  %v2902_v26 = vpack.c.bf16 %v2540_v25, %v2539_v24 }
 0x4b7   : > { %v1155_v12 = vpop.f32.mrb[8].mxu1 }
 0x4b8   : > { %v2732_v13 = vpop.f32.mrb[9].mxu1  ;;  %v1159_v16 = vsel %vm672_vm2, %v1155_v12, -inf }
 0x4b9   : > { %1160 = vmax.xlane.f32.xlu1 %v1159_v16 }
 0x546   : > { %v1161_v17 = vpop.xlane.xlu1 %1160 }
 0x547   : > { %v1162_v18 = vsub.f32 %v1155_v12, %v1161_v17  ;;  %v2530_v12 = vld [vmem:[%s3559_s9 + $0x2] ss:$0 sm:$0xff]  ;;  %v2535_v17 = vld [vmem:[%s3556_s6 + $0x10] sm:$0xff] }
 0x549   : > { %v1163_v19 = vmul.f32 1.442695, %v1162_v18 }
 0x54b   : > { %2962 = vpow2.f32 %v1163_v19 }
 0x555   : > { %v2963_v20 = vpop.eup %2962 }
 0x556   : > { %v1165_v21 = vsel %vm672_vm2, %v2963_v20, 0.0 }
 0x557   : > { %1166 = vadd.xlane.f32.xlu1 %v1165_v21  ;;  %v2537_v21 = vld [vmem:[%s3553_s3 + $0x60] sm:$0xff] }
 0x558   : > { %v2899_v23 = vpack.c.bf16 %v2538_v22, %v2537_v21 }
 0x5e4   : > { %v1167_v27 = vpop.xlane.xlu1 %1166 }
 0x5e5   : > { %2964 = vrcp.f32 %v1167_v27  ;;  %v2544_v27 = vld [vmem:[%s3554_s4 + $0x60] sm:$0xff] }
 0x5ef   : > { %v2965_v28 = vpop.eup %2964 }
 0x5f0   : > { %v1169_v29 = vmul.f32 %v2965_v28, %v2963_v20  ;;  %v2545_v28 = vld [vmem:[%s3554_s4 + $0x68] sm:$0xff] }
 0x5f2   : > { %2736 = vmatmul.mubr.msk.f32.vlgmr.msra.gmra.mrb[10].mxu1 %vm672_vm2, %v1169_v29  ;;  %v2905_v29 = vpack.c.bf16 %v2545_v28, %v2544_v27 }
 0x5f3   : > { %2744 = vmatpush3.msra.mxu1 %v833_v31  ;;  %2745 = vmatprep.mubr.msk.f32.mxu1 %vm3039_vm0, %v3040_v11  ;;  %v2546_v31 = vld [vmem:[%s3554_s4 + $0x70] sm:$0xff] }
 0x5f4   : > { %2886 = vmatprep.subr.bf16.mxu1 %v3038_v3 }
 0x5f6   : > { %2746 = vmatmul.mubr.msk.f32.vlgmr.msra.gmra.mrb[12].mxu1 %vm672_vm2, %v829_v60  ;;  %v2526_v60 = vld [vmem:[%s3555_s5 + $0x48] sm:$0xff] }
 0x5f7   : > { %2888 = vmatpush3.bf16.msra.mxu1 %v2887_v34  ;;  %2767 = vmatprep.mubr.msk.f32.mxu1 %vm3039_vm0, %v3040_v11  ;;  %v2893_v62 = vpack.c.bf16 %v2526_v60, %v2525_v59  ;;  %v2561_v60 = vld [vmem:[%s3556_s6 + $0x18] sm:$0xff] }
 0x5f8   : > { %2889 = vmatprep.subr.bf16.mxu1 %v3038_v3 }
 0x5fb   : > { %2891 = vmatpush3.bf16.msra.mxu1 %v2890_v37 }
 0x5fc   : > { %2781 = vmatprep.subr.mxu1 %v3040_v11 }
 0x5fe   : > { %2768 = vmatmul.mubr.msk.f32.vlgmr.msra.gmra.mrb[14].mxu1 %vm430_vm1, %v3194_v14 }
 0x5ff   : > { %2783 = vmatprep.mubr.msk.f32.mxu1 %vm3039_vm0, %v3040_v11 }
 0x6c5   : > { %v1239_v43 = vpop.f32.mrb[10].mxu1 }
 0x6c6   : > { %v2737_v44 = vpop.f32.mrb[11].mxu1  ;;  %2741 = vmatmul.mubr.msk.f32.vlgmr.msra.gmra.mrb[8].mxu0 %vm672_vm2, %v1239_v43 }
 0x6c7   : > { %2882 = vmatpush3.bf16.msra.mxu0 %v2881_v40  ;;  %2756 = vmatprep.mubr.msk.f32.mxu0 %vm3039_vm0, %v3040_v11  ;;  %v2549_v40 = vld [vmem:[%s3558_s8 + $0x3] ss:$0 sm:$0xff] }
 0x6c8   : > { %2883 = vmatprep.subr.bf16.mxu0 %v3038_v3 }
 0x6c9   : > { %v1387_v46 = vpop.f32.mrb[12].mxu1 }
 0x6ca   : > { %v2747_v47 = vpop.f32.mrb[13].mxu1 }
 0x6cb   : > { %2885 = vmatpush3.bf16.msra.mxu0 %v2884_v45  ;;  %v2551_v45 = vld [vmem:[%s3555_s5 + $0x60] sm:$0xff]  ;;  %v2553_v47 = vld [vmem:[%s3555_s5 + $0x70] sm:$0xff] }
 0x6cc   : > { %2892 = vmatprep.subr.bf16.mxu0 %v3038_v3 }
 0x6ce   : > { %2757 = vmatmul.mubr.msk.f32.vlgmr.msra.gmra.mrb[10].mxu0 %vm430_vm1, %v3196_v15 }
 0x6cf   : > { %2778 = vmatprep.mubr.msk.f32.mxu0 %vm3039_vm0, %v3040_v11  ;;  %2894 = vmatpush3.bf16.msra.mxu0 %v2893_v62 }
 0x6d0   : > { %2895 = vmatprep.subr.bf16.mxu0 %v3038_v3 }
 0x6d1   : > { %v1553_v49 = vpop.f32.mrb[14].mxu1 }
 0x6d2   : > { %v1554_v50 = vadd.f32 %v2523_v48, %v1553_v49  ;;  %v2769_v51 = vpop.f32.mrb[15].mxu1  ;;  %v2554_v49 = vld [vmem:[%s3555_s5 + $0x78] sm:$0xff] }
 0x6d3   : > { %2897 = vmatpush3.bf16.msra.mxu0 %v2896_v0 }
 0x6d4   : > { %2782 = vmatpush3.xpose.msk.msra.mxu1 %vm672_vm2, %v1554_v50  ;;  %2791 = vmatprep.subr.mxu0 %v3040_v11  ;;  %v2914_v50 = vpack.c.bf16 %v2554_v49, %v2553_v47 }
 0x6d5   : > { %2786 = vmatprep.subr.mxu1 %v3040_v11 }
 0x6d6   : > { %2779 = vmatmul.mubr.msk.f32.vlgmr.msra.gmra.mrb[12].mxu0 %vm430_vm1, %v3236_v30 }
 0x6d7   : > { %2793 = vmatprep.mubr.msk.f32.mxu0 %vm3039_vm0, %v3040_v11  ;;  %2792 = vmatpush3.msra.mxu0 %v2535_v17 }
 0x6d8   : > { %2904 = vmatprep.subr.bf16.mxu0 %v3038_v3 }
 0x799   : > { %v1314_v52 = vpop.f32.mrb[8].mxu0 }
 0x79a   : > { %v3381_v53 = vadd.f32 %v1387_v46, %v1314_v52  ;;  %v2742_v54 = vpop.f32.mrb[9].mxu0  ;;  %v2552_v46 = vld [vmem:[%s3555_s5 + $0x68] sm:$0xff] }
 0x79b   : > { %v2911_v48 = vpack.c.bf16 %v2552_v46, %v2551_v45 }
 0x7a1   : > { %v1470_v56 = vpop.f32.mrb[10].mxu0 }
 0x7a2   : > { %v1471_v57 = vadd.f32 %v2516_v55, %v1470_v56  ;;  %v2758_v58 = vpop.f32.mrb[11].mxu0 }
 0x7a4   : > { %2784 = vmatmul.mubr.msk.f32.vlgmr.msra.gmra.mrb[16].mxu1 %vm672_vm2, %v1471_v57 }
 0x7a5   : > { %2788 = vmatprep.mubr.msk.f32.mxu1 %vm3039_vm0, %v3040_v11 }
 0x7a9   : > { %v1636_v10 = vpop.f32.mrb[12].mxu0 }
 0x7aa   : > { %v2780_v13 = vpop.f32.mrb[13].mxu0  ;;  %v1637_v16 = vadd.f32 %v2530_v12, %v1636_v10 }
 0x7ac   : > { %2787 = vmatpush3.msra.mxu1 %v1637_v16 }
 0x7ad   : > { %2898 = vmatprep.subr.bf16.mxu1 %v3038_v3 }
 0x877   : > { %v1712_v1 = vpop.f32.mrb[16].mxu1 }
 0x878   : > { %v2785_v2 = vpop.f32.mrb[17].mxu1  ;;  %v1716_v4 = vsel %vm672_vm2, %v1712_v1, -inf }
 0x879   : > { %1717 = vmax.xlane.f32.xlu0 %v1716_v4  ;;  %v2563_v4 = vld [vmem:[%s3560_s10] ss:$0 sm:$0xff] }
 0x906   : > { %v1718_v5 = vpop.xlane.xlu0 %1717 }
 0x907   : > { %v1719_v6 = vsub.f32 %v1712_v1, %v1718_v5 }
 0x909   : > { %v1720_v7 = vmul.f32 1.442695, %v1719_v6 }
 0x90b   : > { %2966 = vpow2.f32 %v1720_v7 }
 0x915   : > { %v2967_v8 = vpop.eup %2966 }
 0x916   : > { %v1722_v9 = vsel %vm672_vm2, %v2967_v8, 0.0 }
 0x917   : > { %1723 = vadd.xlane.f32.xlu1 %v1722_v9 }
 0x9a4   : > { %v1724_v18 = vpop.xlane.xlu1 %1723 }
 0x9a5   : > { %2968 = vrcp.f32 %v1724_v18 }
 0x9af   : > { %v2969_v19 = vpop.eup %2968 }
 0x9b0   : > { %v1726_v20 = vmul.f32 %v2969_v19, %v2967_v8 }
 0x9b2   : > { %2789 = vmatmul.mubr.msk.f32.vlgmr.msra.gmra.mrb[18].mxu1 %vm672_vm2, %v1726_v20 }
 0x9b3   : > { %2804 = vmatprep.mubr.msk.f32.mxu1 %vm3039_vm0, %v3040_v11  ;;  %2900 = vmatpush3.bf16.msra.mxu1 %v2899_v23 }
 0x9b4   : > { %2901 = vmatprep.subr.bf16.mxu1 %v3038_v3 }
 0x9b7   : > { %2903 = vmatpush3.bf16.msra.mxu1 %v2902_v26 }
 0x9b8   : > { %2910 = vmatprep.subr.bf16.mxu1 %v3038_v3 }
 0x9ba   : > { %2805 = vmatmul.mubr.msk.f32.vlgmr.msra.gmra.mrb[20].mxu1 %vm430_vm1, %v3196_v15  ;;  %v2547_v15 = vld [vmem:[%s3554_s4 + $0x78] sm:$0xff] }
 0x9bb   : > { %2826 = vmatprep.mubr.msk.f32.mxu1 %vm3039_vm0, %v3040_v11  ;;  %v2908_v34 = vpack.c.bf16 %v2547_v15, %v2546_v31  ;;  %2912 = vmatpush3.bf16.msra.mxu1 %v2911_v48 }
 0x9bc   : > { %2913 = vmatprep.subr.bf16.mxu1 %v3038_v3 }
 0x9bf   : > { %2915 = vmatpush3.bf16.msra.mxu1 %v2914_v50 }
 0x9c0   : > { %2839 = vmatprep.subr.mxu1 %v3040_v11 }
 0x9c2   : > { %2827 = vmatmul.mubr.msk.f32.vlgmr.msra.gmra.mrb[22].mxu1 %vm430_vm1, %v3236_v30  ;;  %v2556_v30 = vld [vmem:[%s3559_s9 + $0x3] ss:$0 sm:$0xff] }
 0x9c3   : > { %2841 = vmatprep.mubr.msk.f32.mxu1 %vm3039_vm0, %v3040_v11  ;;  %2840 = vmatpush3.msra.mxu1 %v2561_v60 }
 0xa85   : > { %v1796_v32 = vpop.f32.mrb[18].mxu1 }
 0xa86   : > { %v2790_v33 = vpop.f32.mrb[19].mxu1  ;;  %2794 = vmatmul.mubr.msk.f32.vlgmr.msra.gmra.mrb[14].mxu0 %vm672_vm2, %v1796_v32 }
 0xa87   : > { %2906 = vmatpush3.bf16.msra.mxu0 %v2905_v29  ;;  %2815 = vmatprep.mubr.msk.f32.mxu0 %vm3039_vm0, %v3040_v11 }
 0xa88   : > { %2907 = vmatprep.subr.bf16.mxu0 %v3038_v3 }
 0xa8b   : > { %2909 = vmatpush3.bf16.msra.mxu0 %v2908_v34 }
 0xa8c   : > { %2829 = vmatprep.subr.mxu0 %v3040_v11 }
 0xa8d   : > { %v1955_v35 = vpop.f32.mrb[20].mxu1 }
 0xa8e   : > { %2816 = vmatmul.mubr.msk.f32.vlgmr.msra.gmra.mrb[16].mxu0 %vm430_vm1, %v3194_v14  ;;  %v2806_v36 = vpop.f32.mrb[21].mxu1  ;;  %v1956_v44 = vadd.f32 %v2542_v41, %v1955_v35 }
 0xa8f   : > { %2831 = vmatprep.mubr.msk.f32.mxu0 %vm3039_vm0, %v3040_v11 }
 0xa95   : > { %v2121_v58 = vpop.f32.mrb[22].mxu1 }
 0xa96   : > { %v2122_v59 = vadd.f32 %v2556_v30, %v2121_v58 }
 0xb59   : > { %v1871_v37 = vpop.f32.mrb[14].mxu0 }
 0xb5a   : > { %v1875_v38 = vadd.f32 %v1871_v37, %v3381_v53  ;;  %v2795_v39 = vpop.f32.mrb[15].mxu0 }
 0xb61   : > { %v2038_v42 = vpop.f32.mrb[16].mxu0 }
 0xb62   : > { %v2039_v43 = vadd.f32 %v2549_v40, %v2038_v42  ;;  %v2817_v14 = vpop.f32.mrb[17].mxu0 }
 0xb64   : > { %2830 = vmatpush3.xpose.msk.msra.mxu0 %vm672_vm2, %v2039_v43 }
 0xb65   : > { %2834 = vmatprep.subr.mxu0 %v3040_v11 }
 0xb67   : > { %2832 = vmatmul.mubr.msk.f32.vlgmr.msra.gmra.mrb[18].mxu0 %vm672_vm2, %v1956_v44 }
 0xb68   : > { %2836 = vmatprep.mubr.msk.f32.mxu0 %vm3039_vm0, %v3040_v11  ;;  %v2828_v11 = vpop.f32.mrb[23].mxu1  ;;  %2835 = vmatpush3.msra.mxu0 %v2122_v59 }
 0xc3a   : > { %v2197_v51 = vpop.f32.mrb[18].mxu0 }
 0xc3b   : > { %v2833_v52 = vpop.f32.mrb[19].mxu0  ;;  %v2201_v53 = vsel %vm672_vm2, %v2197_v51, -inf }
 0xc3c   : > { %2202 = vmax.xlane.f32.xlu0 %v2201_v53 }
 0xcc9   : > { %v2203_v54 = vpop.xlane.xlu0 %2202 }
 0xcca   : > { %v2204_v55 = vsub.f32 %v2197_v51, %v2203_v54 }
 0xccc   : > { %v2205_v56 = vmul.f32 1.442695, %v2204_v55 }
 0xcce   : > { %2970 = vpow2.f32 %v2205_v56 }
 0xcd8   : > { %v2971_v57 = vpop.eup %2970 }
 0xcd9   : > { %v2207_v3 = vsel %vm672_vm2, %v2971_v57, 0.0 }
 0xcda   : > { %2208 = vadd.xlane.f32.xlu1 %v2207_v3 }
 0xd67   : > { %v2209_v61 = vpop.xlane.xlu1 %2208 }
 0xd68   : > { %2972 = vrcp.f32 %v2209_v61 }
 0xd72   : > { %v2973_v62 = vpop.eup %2972 }
 0xd73   : > { %v2211_v63 = vmul.f32 %v2973_v62, %v2971_v57 }
 0xd75   : > { %2837 = vmatmul.mubr.msk.f32.vlgmr.msra.gmra.mrb[20].mxu0 %vm672_vm2, %v2211_v63 }
 0xe48   : > { %v2281_v0 = vpop.f32.mrb[20].mxu0 }
 0xe49   : > { %v2838_v1 = vpop.f32.mrb[21].mxu0  ;;  %2842 = vmatmul.mubr.msk.f32.vlgmr.msra.gmra.mrb[24].mxu1 %vm672_vm2, %v2281_v0 }
 0xf1c   : > { %v2356_v2 = vpop.f32.mrb[24].mxu1 }
 0xf1d   : > { %v2360_v5 = vadd.f32 %v2356_v2, %v1875_v38  ;;  %v2843_v6 = vpop.f32.mrb[25].mxu1 }
 0xf1f   : > { %v2368_v7 = vadd.f32 %v2563_v4, %v2360_v5 }
 0xf21   : > { %2369 = vst.msk [vmem:[%s403_s15] sm:$0xff] %vm430_vm1, %v2368_v7 }
 0xf22   : > { %2987 = shalt.err (!%p2984_p3)
}
 0xf23   : > { %s2988_s22 = scalar_lea.hbm %s3507_s29, 128  ;;  %s2992_s24 = scalar_lea.hbm %s3561_s11, 256 }
 0xf24   : > { %p2989_p4 = scmp.ne.s32.totalorder %s3507_s29, %s2988_s22  ;;  %p2993_p9 = scmp.lt.u32.totalorder %s3507_s29, %s3561_s11 }
 0xf25   : > { %p2994_p10 = scmp.lt.u32.totalorder %s2992_s24, %s2988_s22  ;;  %p2996_p12 = scmp.lt.u32.totalorder %s2988_s22, %s3507_s29 }
 0xf26   : > { %p2990_p7 = pnand %p2989_p4, %p3140_p5 }
 0xf27   : > { %p2995_p11 = por %p2994_p10, %p2993_p9 }
 0xf28   : > { %p2991_p8 = pneg %p2990_p7 }
 0xf29   : > { %p2997_p13 = por %p2996_p12, %p2995_p11 }
 0xf2b   : > { %p2998_p0 = pnand %p2997_p13, %p2991_p8 }
 0xf2d   : > { %3001 = shalt.err (!%p2998_p0)
}
 0xf2e   : > { %2916 = dma.vmem_to_hbm [thread:$0]  (%p3140_p5), %s3509_s16, 128, %s3507_s29, %s2371_s12  }
 0xf2f PF: > { %p2922_p1 = scmp.ge.s32.totalorder %s3036_s20, 2  ;;  %s2396_s0 = sand.u32 1, %s3024_s17  }
 0xf30   : > { %s2397_s13 = scalar_lea.sflag [#allocation3], %s2396_s0 }
 0xf31   : > { %p2919_p2 = pnand %p2922_p1, %p3144_p6 }
 0xf33   : > { %3019 = dma.done.wait (!%p2919_p2), %s2397_s13, 128  }
 0xf34   : > { %3021 = vsyncadd (!%p2919_p2), %s2397_s13, 4294967168  ;;  %p21_p3 = scmp.ge.s32.totalorder %s3127_s23, 4   ;;  %s3566_s17 = smov %s3028_s18 }
 0xf35   : > { %s3567_s18 = smov %s3032_s19  ;;  %s3568_s19 = smov %s3138_s26 }
 0xf36   : > { %s3569_s20 = smov %s3127_s23  ;;  %23 = sbr.rel (!%p21_p3) target bundleno = 5 (0x5), region = 126 }
 0xf3d   :  { %2402 = vsyncpa [#allocation3], 1 }
 0xf3e   :  { %2404 = vsyncpa [#allocation3 + $0x1], 1 }

</bundles_post_ra>
